<compile_context>
chip_gen: v7x
topology: tpu7x:2x2x1
jax: 0.10.0
libtpu: 0.0.40
codegen_flags: <defaults>
</compile_context>

<pallas_src>
import functools
import math

import jax
import jax.numpy as jnp
from jax.experimental import pallas as pl
from jax.experimental.pallas import tpu as pltpu

LN_EPS = 1e-5  # torch.nn.LayerNorm default


def _round_up(x, m):
    return ((x + m - 1) // m) * m


def _patch_embed_kernel(p_ref, w_ref, b_ref, g_ref, beta_ref, o_ref, *, inv_d):
    # p_ref: (TM, K) bf16 patch rows; w_ref: (K, Dp) bf16;
    # b/g/beta: (1, Dp) f32 (zero in padded columns); o_ref: (TM, Dp).
    y = jnp.dot(p_ref[...], w_ref[...], preferred_element_type=jnp.float32)
    y = y + b_ref[...]  # conv bias

    # One-pass LayerNorm statistics over the real embed dim D.  Padded columns
    # of y are exact zeros (zero weights + zero bias), so summing over all Dp
    # columns equals summing over the real D columns; the divisor is 1/D.
    s1 = jnp.sum(y, axis=-1, keepdims=True)
    s2 = jnp.sum(y * y, axis=-1, keepdims=True)
    mean = s1 * inv_d
    var = jnp.maximum(s2 * inv_d - mean * mean, 0.0)   # biased variance (torch LN)
    inv_std = jax.lax.rsqrt(var + LN_EPS)              # EUP path

    o_ref[...] = ((y - mean) * inv_std * g_ref[...] + beta_ref[...]).astype(o_ref.dtype)


def _im2col_nhwc(x_nchw, kh, kw, stride, pad):
    """NCHW input -> (B*Ho*Wo, kh*kw*C) patch matrix with (kh, kw, C) feature
    ordering (contiguous C runs per window tap), plus (Ho, Wo)."""
    B, C, H, W = x_nchw.shape
    Ho = (H + 2 * pad - kh) // stride + 1
    Wo = (W + 2 * pad - kw) // stride + 1
    x = jnp.transpose(x_nchw, (0, 2, 3, 1))                       # NHWC
    xp = jnp.pad(x, ((0, 0), (pad, pad), (pad, pad), (0, 0)))
    cols = []
    for i in range(kh):
        for j in range(kw):
            cols.append(xp[:, i:i + stride * Ho:stride, j:j + stride * Wo:stride, :])
    p = jnp.stack(cols, axis=3)                                   # (B, Ho, Wo, kh*kw, C)
    p = p.reshape(B * Ho * Wo, kh * kw * C)
    return p, Ho, Wo


def overlap_patch_embedding(x, conv_w, conv_b, ln_w, ln_b, *, stride, tile_m=256):
    """x: (B, C, H, W) NCHW. conv_w: (D, C, kh, kw). Returns (out, Ho, Wo)."""
    B, C, H, W = x.shape
    D, _, kh, kw = conv_w.shape
    pad = kh // 2

    # TODO(synk): for large images the im2col matrix could instead be built
    # inside the kernel from HBM row bands (memory_space=pl.ANY + manual DMA)
    # to avoid materializing the kh*kw-times-inflated patch matrix in HBM.
    patches, Ho, Wo = _im2col_nhwc(x, kh, kw, stride, pad)        # (N, K) f32
    N, K = patches.shape

    # Tiling: large M tiles (multiple of 16 for bf16 sublanes), pad N to a tile
    # multiple, pad D to a lane-dense multiple of 128.
    tile_m = min(int(tile_m), _round_up(N, 16))
    tile_m = _round_up(tile_m, 16)
    N_pad = _round_up(N, tile_m)
    D_pad = _round_up(D, 128)

    if N_pad != N:
        patches = jnp.pad(patches, ((0, N_pad - N), (0, 0)))

    # (kh, kw, C, D) ordering matches the patch features; embed dim padded with
    # exact-zero columns so LN statistics over the real D are untouched.
    w_mat = jnp.transpose(conv_w, (2, 3, 1, 0)).reshape(K, D)
    w_mat = jnp.pad(w_mat, ((0, 0), (0, D_pad - D)))
    b_row = jnp.pad(conv_b.reshape(1, D), ((0, 0), (0, D_pad - D))).astype(jnp.float32)
    g_row = jnp.pad(ln_w.reshape(1, D), ((0, 0), (0, D_pad - D))).astype(jnp.float32)
    beta_row = jnp.pad(ln_b.reshape(1, D), ((0, 0), (0, D_pad - D))).astype(jnp.float32)

    # bf16 MXU operands; accumulation and LN epilogue stay in f32 in-kernel.
    patches_bf = patches.astype(jnp.bfloat16)
    w_bf = w_mat.astype(jnp.bfloat16)

    kernel = functools.partial(_patch_embed_kernel, inv_d=1.0 / D)

    out = pl.pallas_call(
        kernel,
        out_shape=jax.ShapeDtypeStruct((N_pad, D_pad), x.dtype),
        grid_spec=pltpu.PrefetchScalarGridSpec(
            num_scalar_prefetch=0,
            grid=(N_pad // tile_m,),
            in_specs=[
                pl.BlockSpec((tile_m, K), lambda i: (i, 0)),
                pl.BlockSpec((K, D_pad), lambda i: (0, 0)),
                pl.BlockSpec((1, D_pad), lambda i: (0, 0)),
                pl.BlockSpec((1, D_pad), lambda i: (0, 0)),
                pl.BlockSpec((1, D_pad), lambda i: (0, 0)),
            ],
            out_specs=pl.BlockSpec((tile_m, D_pad), lambda i: (i, 0)),
        ),
        compiler_params=pltpu.CompilerParams(
            dimension_semantics=("parallel",)),
    )(patches_bf, w_bf, b_row, g_row, beta_row)

    out = out[:N, :D].reshape(B, Ho * Wo, D)
    return out, Ho, Wo


if __name__ == "__main__":
    # Small shapes consistent with the module: image=16, patch=7, stride=4,
    # in_chans=4, embed_dim=32  ->  Ho = Wo = 16 // 4 = 4.
    B, C, Himg, Wimg = 2, 4, 16, 16
    patch, stride, embed_dim = 7, 4, 32

    key = jax.random.PRNGKey(0)
    kx, kw = jax.random.split(key)

    x = jax.random.normal(kx, (B, C, Himg, Wimg), dtype=jnp.float32)

    # Deterministic parameter init mirroring the module's _init_weights.
    fan_out = patch * patch * embed_dim
    conv_w = (jax.random.normal(kw, (embed_dim, C, patch, patch), dtype=jnp.float32)
              * math.sqrt(2.0 / fan_out))
    conv_b = jnp.zeros((embed_dim,), dtype=jnp.float32)
    ln_w = jnp.ones((embed_dim,), dtype=jnp.float32)
    ln_b = jnp.zeros((embed_dim,), dtype=jnp.float32)

    out, Ho, Wo = overlap_patch_embedding(x, conv_w, conv_b, ln_w, ln_b, stride=stride)
    out = jax.block_until_ready(out)
    assert out.shape == (B, Ho * Wo, embed_dim), out.shape

    # Reference check (pure JAX f32 conv + layernorm); loose tolerance because
    # the kernel uses bf16 MXU operands (f32 accumulation).
    ref = jax.lax.conv_general_dilated(
        x, conv_w, window_strides=(stride, stride),
        padding=[(patch // 2, patch // 2)] * 2,
        dimension_numbers=("NCHW", "OIHW", "NCHW"))
    ref = ref + conv_b[None, :, None, None]
    ref = ref.reshape(B, embed_dim, Ho * Wo).transpose(0, 2, 1)
    mu = ref.mean(-1, keepdims=True)
    var = ((ref - mu) ** 2).mean(-1, keepdims=True)
    ref = (ref - mu) / jnp.sqrt(var + LN_EPS) * ln_w + ln_b

    assert jnp.allclose(out, ref, atol=5e-2, rtol=5e-2), float(jnp.max(jnp.abs(out - ref)))

    print("KERNEL_OK")
</pallas_src>

<mosaic_0001>
module attributes {stable_mosaic.version = 11 : i64} {
  func.func @_patch_embed_kernel(%arg0: i32, %arg1: memref<32x196xbf16, #tpu.memory_space<vmem>>, %arg2: memref<196x128xbf16, #tpu.memory_space<vmem>>, %arg3: memref<1x128xf32, #tpu.memory_space<vmem>>, %arg4: memref<1x128xf32, #tpu.memory_space<vmem>>, %arg5: memref<1x128xf32, #tpu.memory_space<vmem>>, %arg6: memref<32x128xf32, #tpu.memory_space<vmem>>) attributes {dimension_semantics = [#tpu.dimension_semantics<parallel>], iteration_bounds = array<i64: 1>, scalar_prefetch = 0 : i64, scratch_operands = 0 : i64, tpu.core_type = #tpu.core_type<tc>, window_params = [{transform_indices = @transform_0, window_bounds = array<i64: 32, 196>}, {pipeline_mode = #tpu.pipeline_mode<synchronous>, transform_indices = @transform_1, window_bounds = array<i64: 196, 128>}, {pipeline_mode = #tpu.pipeline_mode<synchronous>, transform_indices = @transform_2, window_bounds = array<i64: 1, 128>}, {pipeline_mode = #tpu.pipeline_mode<synchronous>, transform_indices = @transform_3, window_bounds = array<i64: 1, 128>}, {pipeline_mode = #tpu.pipeline_mode<synchronous>, transform_indices = @transform_4, window_bounds = array<i64: 1, 128>}, {transform_indices = @transform_5, window_bounds = array<i64: 32, 128>}]} {
    %c0 = arith.constant 0 : index
    %c0_0 = arith.constant 0 : index
    %0 = vector.load %arg1[%c0, %c0_0] : memref<32x196xbf16, #tpu.memory_space<vmem>>, vector<32x196xbf16>
    %c0_1 = arith.constant 0 : index
    %c0_2 = arith.constant 0 : index
    %1 = vector.load %arg2[%c0_1, %c0_2] : memref<196x128xbf16, #tpu.memory_space<vmem>>, vector<196x128xbf16>
    %cst = arith.constant dense<0.000000e+00> : vector<32x128xf32>
    %2 = tpu.matmul %0, %1, %cst {dimension_numbers = #tpu.dot_dimension_numbers<[1], [0], [0], [1], [0, 0, 1, 1], [], []>} : vector<32x196xbf16>, vector<196x128xbf16>, vector<32x128xf32> -> vector<32x128xf32>
    %c0_3 = arith.constant 0 : index
    %c0_4 = arith.constant 0 : index
    %3 = vector.load %arg3[%c0_3, %c0_4] : memref<1x128xf32, #tpu.memory_space<vmem>>, vector<1x128xf32>
    %4 = vector.broadcast %3 : vector<1x128xf32> to vector<32x128xf32>
    %5 = arith.addf %2, %4 : vector<32x128xf32>
    %cst_5 = arith.constant dense<0.000000e+00> : vector<32xf32>
    %6 = vector.multi_reduction <add>, %5, %cst_5 [1] : vector<32x128xf32> to vector<32xf32>
    %7 = vector.shape_cast %6 : vector<32xf32> to vector<32x1xf32>
    %8 = arith.mulf %5, %5 : vector<32x128xf32>
    %cst_6 = arith.constant dense<0.000000e+00> : vector<32xf32>
    %9 = vector.multi_reduction <add>, %8, %cst_6 [1] : vector<32x128xf32> to vector<32xf32>
    %10 = vector.shape_cast %9 : vector<32xf32> to vector<32x1xf32>
    %cst_7 = arith.constant 3.125000e-02 : f32
    %11 = vector.broadcast %cst_7 : f32 to vector<32x1xf32>
    %12 = arith.mulf %7, %11 : vector<32x1xf32>
    %cst_8 = arith.constant 3.125000e-02 : f32
    %13 = vector.broadcast %cst_8 : f32 to vector<32x1xf32>
    %14 = arith.mulf %10, %13 : vector<32x1xf32>
    %15 = arith.mulf %12, %12 : vector<32x1xf32>
    %16 = arith.subf %14, %15 : vector<32x1xf32>
    %cst_9 = arith.constant 0.000000e+00 : f32
    %17 = vector.broadcast %cst_9 : f32 to vector<32x1xf32>
    %18 = arith.maximumf %16, %17 : vector<32x1xf32>
    %cst_10 = arith.constant 9.99999974E-6 : f32
    %19 = vector.broadcast %cst_10 : f32 to vector<32x1xf32>
    %20 = arith.addf %18, %19 : vector<32x1xf32>
    %21 = math.rsqrt %20 : vector<32x1xf32>
    %22 = vector.broadcast %12 : vector<32x1xf32> to vector<32x128xf32>
    %23 = arith.subf %5, %22 : vector<32x128xf32>
    %24 = vector.broadcast %21 : vector<32x1xf32> to vector<32x128xf32>
    %25 = arith.mulf %23, %24 : vector<32x128xf32>
    %c0_11 = arith.constant 0 : index
    %c0_12 = arith.constant 0 : index
    %26 = vector.load %arg4[%c0_11, %c0_12] : memref<1x128xf32, #tpu.memory_space<vmem>>, vector<1x128xf32>
    %27 = vector.broadcast %26 : vector<1x128xf32> to vector<32x128xf32>
    %28 = arith.mulf %25, %27 : vector<32x128xf32>
    %c0_13 = arith.constant 0 : index
    %c0_14 = arith.constant 0 : index
    %29 = vector.load %arg5[%c0_13, %c0_14] : memref<1x128xf32, #tpu.memory_space<vmem>>, vector<1x128xf32>
    %30 = vector.broadcast %29 : vector<1x128xf32> to vector<32x128xf32>
    %31 = arith.addf %28, %30 : vector<32x128xf32>
    %c0_15 = arith.constant 0 : index
    %c0_16 = arith.constant 0 : index
    %32 = vector.load %arg6[%c0_15, %c0_16] : memref<32x128xf32, #tpu.memory_space<vmem>>, vector<32x128xf32>
    tpu.vector_store %arg6[%c0_15, %c0_16], %31 {strides = array<i32>} : memref<32x128xf32, #tpu.memory_space<vmem>>, vector<32x128xf32>,
    return
  }
  func.func @transform_0(%arg0: i32) -> (i32, i32) {
    %c0_i32 = arith.constant 0 : i32
    %c0_i32_0 = arith.constant 0 : i32
    return %arg0, %c0_i32 : i32, i32
  }
  func.func @transform_1(%arg0: i32) -> (i32, i32) {
    %c0_i32 = arith.constant 0 : i32
    %c0_i32_0 = arith.constant 0 : i32
    %c0_i32_1 = arith.constant 0 : i32
    return %c0_i32, %c0_i32_0 : i32, i32
  }
  func.func @transform_2(%arg0: i32) -> (i32, i32) {
    %c0_i32 = arith.constant 0 : i32
    %c0_i32_0 = arith.constant 0 : i32
    %c0_i32_1 = arith.constant 0 : i32
    return %c0_i32, %c0_i32_0 : i32, i32
  }
  func.func @transform_3(%arg0: i32) -> (i32, i32) {
    %c0_i32 = arith.constant 0 : i32
    %c0_i32_0 = arith.constant 0 : i32
    %c0_i32_1 = arith.constant 0 : i32
    return %c0_i32, %c0_i32_0 : i32, i32
  }
  func.func @transform_4(%arg0: i32) -> (i32, i32) {
    %c0_i32 = arith.constant 0 : i32
    %c0_i32_0 = arith.constant 0 : i32
    %c0_i32_1 = arith.constant 0 : i32
    return %c0_i32, %c0_i32_0 : i32, i32
  }
  func.func @transform_5(%arg0: i32) -> (i32, i32) {
    %c0_i32 = arith.constant 0 : i32
    %c0_i32_0 = arith.constant 0 : i32
    return %arg0, %c0_i32 : i32, i32
  }
}

</mosaic_0001>

<bundles_post_ra>
// kernel: tpu_custom_call.1
= control target key start
LH: loop header
LB: loop body
LE: loop exit
PB: predicated region body
PF: predicated region fallthrough
CT: control target
= control target key end

     0   :  { %10 = vsyncpa [#allocation3], 0  ;;  %s621_s0 = inlined_call_operand.hbm [shape: bf16[32,196], index: 0, kind: input, shape index: {}]   ;;  %s622_s1 = inlined_call_operand.hbm [shape: bf16[196,128], index: 1, kind: input, shape index: {}]   ;;  %s623_s2 = inlined_call_operand.vmem [shape: f32[1,128], index: 2, kind: input, shape index: {}]   ;;  %s624_s3 = inlined_call_operand.vmem [shape: f32[1,128], index: 3, kind: input, shape index: {}]   ;;  %s625_s4 = inlined_call_operand.vmem [shape: f32[1,128], index: 4, kind: input, shape index: {}]   ;;  %s626_s5 = inlined_call_operand.hbm [shape: f32[32,128], index: 5, kind: output, shape index: {}]  }
   0x1   :  { %11 = vsyncpa [#allocation6], 0 }
   0x2   :  { %12 = vsyncpa [#allocation4], 0  ;;  %s494_s18 = smov [#allocation2]   ;;  %s422_s22 = scalar_lea.hbm %s621_s0, 512 }
   0x3   :  { %s18_s19 = sshll.u32 %s494_s18, 4  ;;  %p423_p0 = scmp.ne.s32.totalorder %s621_s0, %s422_s22  ;;  %s19_s19 = int_to_ptr.vmem [resolvable:$true] %s18_s19 }
   0x4   :  { %p426_p1 = scmp.lt.u32.totalorder %s422_s22, %s621_s0 }
   0x6   :  { %p428_p2 = pnand %p426_p1, %p423_p0 }
   0x8   :  { %431 = shalt.err (!%p428_p2)
}
   0x9   :  { %s432_s27 = scalar_lea.vmem %s19_s19, 512  ;;  %p437_p4 = scmp.lt.s32.totalorder %s19_s19, %s19_s19 }
   0xa   :  { %p433_p3 = scmp.ne.s32.totalorder %s19_s19, %s432_s27  ;;  %p438_p5 = scmp.lt.s32.totalorder %s432_s27, %s432_s27 }
   0xc   :  { %p439_p6 = por %p438_p5, %p437_p4 }
   0xe   :  { %p440_p7 = pnand %p439_p6, %p433_p3 }
  0x10   :  { %443 = shalt.err (!%p440_p7)
}
  0x11   :  { %s495_s28 = smov 128   ;;  %s496_s29 = smov 8  }
  0x12   :  { %24 = dma.hbm_to_vmem [thread:$0]  %s621_s0, 512, %s19_s19, [#allocation3], %s495_s28, %s495_s28, %s496_s29  }
  0x13   :  { %s497_s7 = smov [#allocation5]   ;;  %s444_s11 = scalar_lea.hbm %s622_s1, 1600 }
  0x14   :  { %s30_s8 = sshll.u32 %s497_s7, 4  ;;  %p445_p8 = scmp.ne.s32.totalorder %s622_s1, %s444_s11  ;;  %s31_s8 = int_to_ptr.vmem [resolvable:$true] %s30_s8 }
  0x15   :  { %p448_p9 = scmp.lt.u32.totalorder %s444_s11, %s622_s1 }
  0x17   :  { %p450_p10 = pnand %p448_p9, %p445_p8 }
  0x19   :  { %453 = shalt.err (!%p450_p10)
}
  0x1a   :  { %s454_s16 = scalar_lea.vmem %s31_s8, 1600  ;;  %p459_p12 = scmp.lt.s32.totalorder %s31_s8, %s31_s8 }
  0x1b   :  { %p455_p11 = scmp.ne.s32.totalorder %s31_s8, %s454_s16  ;;  %p460_p13 = scmp.lt.s32.totalorder %s454_s16, %s454_s16 }
  0x1d   :  { %p461_p0 = por %p460_p13, %p459_p12 }
  0x1f   :  { %p462_p1 = pnand %p461_p0, %p455_p11 }
  0x21   :  { %465 = shalt.err (!%p462_p1)
}
  0x22   :  { %s498_s0 = smov 64   ;;  %s499_s17 = smov 4  }
  0x23   :  { %36 = dma.hbm_to_vmem [thread:$0]  %s622_s1, 1600, %s31_s8, [#allocation6], %s498_s0, %s498_s0, %s499_s17  }
  0x24   :  { %488 = dma.done.wait [#allocation3], 512  }
  0x25   :  { %489 = vsyncadd [#allocation3], 4294966784 }
  0x26   :  { %490 = dma.done.wait [#allocation6], 1600  }
  0x27   :  { %491 = vsyncadd [#allocation6], 4294965696  ;;  %v500_v0 = vmov 0   ;;  %v395_v1 = vld [vmem:[#allocation5] sm:$0xff]   ;;  %v396_v2 = vld [vmem:[#allocation5 + $0x8] sm:$0xff]   ;;  %vm179_vm0 = vcmask 556032  }
  0x28   :  { %190 = vmatprep.subr.bf16.mxu0 %v500_v0  ;;  %361 = vmatprep.subr.bf16.mxu1 %v500_v0  ;;  %v397_v3 = vld [vmem:[#allocation5 + $0x10] sm:$0xff]   ;;  %v398_v4 = vld [vmem:[#allocation5 + $0x18] sm:$0xff]   ;;  %v410_v5 = vld [vmem:[#allocation2 + $0x4] ss:$8 sps:$4 sm:$0xff]   ;;  %vm186_vm1 = vcmask 1041408  }
  0x29   :  { %191 = vmatpush1.bf16.msra.mxu0 %v395_v1  ;;  %374 = vmatpush1.bf16.msra.mxu1 %v395_v1  ;;  %v399_v6 = vld [vmem:[#allocation5 + $0x20] sm:$0xff]   ;;  %v413_v7 = vld [vmem:[#allocation2 + $0x14] ss:$8 sps:$4 sm:$0xff]   ;;  %v400_v8 = vld [vmem:[#allocation5 + $0x28] sm:$0xff]  }
  0x2a   :  { %192 = vmatprep.subr.bf16.mxu0 %v500_v0  ;;  %362 = vmatprep.subr.bf16.mxu1 %v500_v0  ;;  %v401_v9 = vld [vmem:[#allocation5 + $0x30] sm:$0xff]   ;;  %v402_v10 = vld [vmem:[#allocation5 + $0x38] sm:$0xff]   ;;  %v403_v11 = vld [vmem:[#allocation5 + $0x40] sm:$0xff]  }
  0x2b   :  { %357 = vmatprep.mubr.msk.bf16.mxu0 %vm179_vm0, %v410_v5  ;;  %358 = vmatprep.mubr.msk.bf16.mxu1 %vm179_vm0, %v413_v7  ;;  %v404_v12 = vld [vmem:[#allocation5 + $0x48] sm:$0xff]   ;;  %v405_v13 = vld [vmem:[#allocation5 + $0x50] sm:$0xff]   ;;  %v406_v14 = vld [vmem:[#allocation5 + $0x58] sm:$0xff]  }
  0x2c   :  { %v407_v15 = vld [vmem:[#allocation5 + $0x60] ss:$0 sps:$4 sm:$0x33]   ;;  %v411_v18 = vld [vmem:[#allocation2 + $0x10] ss:$8 sps:$4 sm:$0xff]  }
  0x2d   :  { %193 = vmatpush1.bf16.msra.mxu0 %v396_v2  ;;  %375 = vmatpush1.bf16.msra.mxu1 %v396_v2  ;;  %v188_v16 = vsel %vm186_vm1, %v407_v15, 0  ;;  %v408_v17 = vld [vmem:[#allocation2] ss:$8 sps:$4 sm:$0xff]  }
  0x2e   :  { %194 = vmatprep.subr.bf16.mxu0 %v500_v0  ;;  %363 = vmatprep.subr.bf16.mxu1 %v500_v0  ;;  %v339_v19 = vld [vmem:[%s623_s2] ss:$0 sm:$0xff] }
  0x2f   :  { %v359_v7 = vld [vmem:[%s624_s3] ss:$0 sm:$0xff]  ;;  %s501_s3 = smov [#allocation7]  }
  0x30   :  { %s326_s24 = sshll.u32 %s501_s3, 4  ;;  %s327_s24 = int_to_ptr.vmem [resolvable:$true] %s326_s24 }
  0x31   :  { %195 = vmatpush1.bf16.msra.mxu0 %v397_v3  ;;  %376 = vmatpush1.bf16.msra.mxu1 %v397_v3  ;;  %p471_p3 = scmp.lt.s32.totalorder %s327_s24, %s327_s24 }
  0x32   :  { %196 = vmatprep.subr.bf16.mxu0 %v500_v0  ;;  %364 = vmatprep.subr.bf16.mxu1 %v500_v0 }
  0x35   :  { %197 = vmatpush1.bf16.msra.mxu0 %v398_v4  ;;  %377 = vmatpush1.bf16.msra.mxu1 %v398_v4 }
  0x36   :  { %198 = vmatprep.subr.bf16.mxu0 %v500_v0  ;;  %365 = vmatprep.subr.bf16.mxu1 %v500_v0 }
  0x39   :  { %199 = vmatpush1.bf16.msra.mxu0 %v399_v6  ;;  %378 = vmatpush1.bf16.msra.mxu1 %v399_v6 }
  0x3a   :  { %200 = vmatprep.subr.bf16.mxu0 %v500_v0  ;;  %366 = vmatprep.subr.bf16.mxu1 %v500_v0 }
  0x3d   :  { %201 = vmatpush1.bf16.msra.mxu0 %v400_v8  ;;  %379 = vmatpush1.bf16.msra.mxu1 %v400_v8 }
  0x3e   :  { %202 = vmatprep.subr.bf16.mxu0 %v500_v0  ;;  %367 = vmatprep.subr.bf16.mxu1 %v500_v0 }
  0x41   :  { %203 = vmatpush1.bf16.msra.mxu0 %v401_v9  ;;  %380 = vmatpush1.bf16.msra.mxu1 %v401_v9 }
  0x42   :  { %204 = vmatprep.subr.bf16.mxu0 %v500_v0  ;;  %368 = vmatprep.subr.bf16.mxu1 %v500_v0 }
  0x45   :  { %205 = vmatpush1.bf16.msra.mxu0 %v402_v10  ;;  %381 = vmatpush1.bf16.msra.mxu1 %v402_v10 }
  0x46   :  { %206 = vmatprep.subr.bf16.mxu0 %v500_v0  ;;  %369 = vmatprep.subr.bf16.mxu1 %v500_v0 }
  0x49   :  { %207 = vmatpush1.bf16.msra.mxu0 %v403_v11  ;;  %382 = vmatpush1.bf16.msra.mxu1 %v403_v11  ;;  %v360_v11 = vld [vmem:[%s625_s4] ss:$0 sm:$0xff]  ;;  %s466_s4 = scalar_lea.vmem %s327_s24, 512 }
  0x4a   :  { %208 = vmatprep.subr.bf16.mxu0 %v500_v0  ;;  %370 = vmatprep.subr.bf16.mxu1 %v500_v0  ;;  %p467_p2 = scmp.ne.s32.totalorder %s327_s24, %s466_s4  ;;  %p472_p4 = scmp.lt.s32.totalorder %s466_s4, %s466_s4 }
  0x4c   :  { %p473_p5 = por %p472_p4, %p471_p3 }
  0x4d   :  { %209 = vmatpush1.bf16.msra.mxu0 %v404_v12  ;;  %383 = vmatpush1.bf16.msra.mxu1 %v404_v12 }
  0x4e   :  { %210 = vmatprep.subr.bf16.mxu0 %v500_v0  ;;  %371 = vmatprep.subr.bf16.mxu1 %v500_v0  ;;  %p474_p6 = pnand %p473_p5, %p467_p2 }
  0x51   :  { %211 = vmatpush1.bf16.msra.mxu0 %v405_v13  ;;  %384 = vmatpush1.bf16.msra.mxu1 %v405_v13 }
  0x52   :  { %212 = vmatprep.subr.bf16.mxu0 %v500_v0  ;;  %372 = vmatprep.subr.bf16.mxu1 %v500_v0 }
  0x55   :  { %213 = vmatpush1.bf16.msra.mxu0 %v406_v14  ;;  %385 = vmatpush1.bf16.msra.mxu1 %v406_v14 }
  0x56   :  { %214 = vmatprep.subr.bf16.mxu0 %v500_v0  ;;  %373 = vmatprep.subr.bf16.mxu1 %v500_v0 }
  0x59   :  { %215 = vmatpush1.bf16.msra.mxu0 %v188_v16  ;;  %386 = vmatpush1.bf16.msra.mxu1 %v188_v16 }
  0x5c   :  { %223 = vmatmul.mubr.bf16.vlgmr.msra.gmra.mrb[0].mxu0 %v408_v17  ;;  %231 = vmatmul.mubr.bf16.vlgmr.msra.gmra.mrb[0].mxu1 %v411_v18 }
 0x12f   :  { %v224_v20 = vpop.f32.mrb[0].mxu0  ;;  %v232_v21 = vpop.f32.mrb[0].mxu1 }
 0x130   :  { %v588_v22 = vadd.f32 %v339_v19, %v224_v20  ;;  %v590_v23 = vadd.f32 %v339_v19, %v232_v21  ;;  %v226_v24 = vpop.f32.mrb[1].mxu0  ;;  %v234_v25 = vpop.f32.mrb[1].mxu1 }
 0x131   :  { %v227_v26 = vpop.f32.mrb[2].mxu0  ;;  %v235_v27 = vpop.f32.mrb[2].mxu1 }
 0x132   :  { %v237_v28 = vpop.f32.mrb[3].mxu1  ;;  %243 = vadd.xlane.f32.xlu1 %v590_v23  ;;  %v229_v29 = vpop.f32.mrb[3].mxu0  ;;  %239 = vadd.xlane.f32.xlu0 %v588_v22  ;;  %v228_v30 = vadd.f32 %v339_v19, %v227_v26  ;;  %v236_v31 = vadd.f32 %v339_v19, %v235_v27  ;;  %v247_v33 = vmul.f32 %v588_v22, %v588_v22 }
 0x133   :  { %v249_v35 = vmul.f32 %v590_v23, %v590_v23 }
 0x134   :  { %v248_v32 = vmul.f32 %v228_v30, %v228_v30  ;;  %v250_v34 = vmul.f32 %v236_v31, %v236_v31 }
 0x136   :  { %245 = vadd.xlane.f32.xlu1 %v236_v31  ;;  %241 = vadd.xlane.f32.xlu0 %v228_v30 }
 0x13a   :  { %253 = vadd.xlane.f32.xlu1 %v248_v32  ;;  %251 = vadd.xlane.f32.xlu0 %v247_v33 }
 0x13e   :  { %257 = vadd.xlane.f32.xlu1 %v250_v34  ;;  %255 = vadd.xlane.f32.xlu0 %v249_v35 }
 0x1bf   :  { %v244_v36 = vpop.xlane.xlu1 %243  ;;  %v240_v37 = vpop.xlane.xlu0 %239 }
 0x1c0   :  { %v259_v40 = vmul.f32 0.03125, %v240_v37  ;;  %v261_v42 = vmul.f32 0.03125, %v244_v36 }
 0x1c2   :  { %v267_v46 = vmul.f32 %v259_v40, %v259_v40  ;;  %v269_v52 = vmul.f32 %v261_v42, %v261_v42  ;;  %v287_v6 = vsub.f32 %v588_v22, %v259_v40  ;;  %v289_v15 = vsub.f32 %v590_v23, %v261_v42 }
 0x1c3   :  { %v246_v38 = vpop.xlane.xlu1 %245  ;;  %v242_v39 = vpop.xlane.xlu0 %241 }
 0x1c4   :  { %v260_v41 = vmul.f32 0.03125, %v242_v39  ;;  %v262_v43 = vmul.f32 0.03125, %v246_v38 }
 0x1c6   :  { %v268_v47 = vmul.f32 %v260_v41, %v260_v41  ;;  %v270_v53 = vmul.f32 %v262_v43, %v262_v43  ;;  %v288_v4 = vsub.f32 %v228_v30, %v260_v41  ;;  %v290_v12 = vsub.f32 %v236_v31, %v262_v43 }
 0x1c7   :  { %v254_v44 = vpop.xlane.xlu1 %253  ;;  %v252_v45 = vpop.xlane.xlu0 %251 }
 0x1c8   :  { %v264_v48 = vmul.f32 0.03125, %v254_v44  ;;  %v263_v49 = vmul.f32 0.03125, %v252_v45 }
 0x1ca   :  { %v272_v50 = vsub.f32 %v264_v48, %v268_v47  ;;  %v271_v51 = vsub.f32 %v263_v49, %v267_v46 }
 0x1cb   :  { %v258_v54 = vpop.xlane.xlu1 %257  ;;  %v256_v55 = vpop.xlane.xlu0 %255 }
 0x1cc   :  { %v276_v56 = vmax.f32 %v272_v50, 0.0  ;;  %v275_v57 = vmax.f32 %v271_v51, 0.0  ;;  %v266_v58 = vmul.f32 0.03125, %v258_v54  ;;  %v265_v59 = vmul.f32 0.03125, %v256_v55 }
 0x1ce   :  { %v280_v60 = vadd.f32 1e-05, %v276_v56  ;;  %v279_v61 = vadd.f32 1e-05, %v275_v57  ;;  %v274_v62 = vsub.f32 %v266_v58, %v270_v53  ;;  %v273_v63 = vsub.f32 %v265_v59, %v269_v52 }
 0x1d0   :  { %414 = vrsqrt.f32 %v280_v60  ;;  %v278_v0 = vmax.f32 %v274_v62, 0.0  ;;  %v277_v1 = vmax.f32 %v273_v63, 0.0 }
 0x1d1   :  { %416 = vrsqrt.f32 %v279_v61 }
 0x1d2   :  { %v282_v2 = vadd.f32 1e-05, %v278_v0  ;;  %v281_v3 = vadd.f32 1e-05, %v277_v1 }
 0x1d4   :  { %418 = vrsqrt.f32 %v282_v2 }
 0x1d5   :  { %420 = vrsqrt.f32 %v281_v3 }
 0x1da   :  { %v415_v5 = vpop.eup %414 }
 0x1db   :  { %v417_v8 = vpop.eup %416  ;;  %v292_v9 = vmul.f32 %v415_v5, %v288_v4 }
 0x1dc   :  { %v291_v10 = vmul.f32 %v417_v8, %v287_v6 }
 0x1dd   :  { %v303_v13 = vmul.f32 %v359_v7, %v292_v9 }
 0x1de   :  { %v419_v14 = vpop.eup %418  ;;  %v302_v16 = vmul.f32 %v359_v7, %v291_v10 }
 0x1df   :  { %v421_v17 = vpop.eup %420  ;;  %v294_v18 = vmul.f32 %v419_v14, %v290_v12  ;;  %v314_v19 = vadd.f32 %v360_v11, %v303_v13 }
 0x1e0   :  { %v293_v20 = vmul.f32 %v421_v17, %v289_v15  ;;  %v313_v21 = vadd.f32 %v360_v11, %v302_v16 }
 0x1e1   :  { %v305_v22 = vmul.f32 %v359_v7, %v294_v18  ;;  %318 = vst [vmem:[#allocation7 + $0x8] sm:$0xff] %v314_v19 }
 0x1e2   :  { %v304_v24 = vmul.f32 %v359_v7, %v293_v20  ;;  %317 = vst [vmem:[#allocation7] sm:$0xff] %v313_v21 }
 0x1e3   :  { %v316_v25 = vadd.f32 %v360_v11, %v305_v22 }
 0x1e4   :  { %v315_v26 = vadd.f32 %v360_v11, %v304_v24 }
 0x1e5   :  { %320 = vst [vmem:[#allocation7 + $0x18] sm:$0xff] %v316_v25 }
 0x1e6   :  { %319 = vst [vmem:[#allocation7 + $0x10] sm:$0xff] %v315_v26 }
 0x1e7   :  { %477 = shalt.err (!%p474_p6)
}
 0x1e8   :  { %s478_s27 = scalar_lea.hbm %s626_s5, 512 }
 0x1e9   :  { %p479_p7 = scmp.ne.s32.totalorder %s626_s5, %s478_s27  ;;  %p482_p8 = scmp.lt.u32.totalorder %s478_s27, %s626_s5 }
 0x1eb   :  { %p484_p9 = pnand %p482_p8, %p479_p7 }
 0x1ed   :  { %487 = shalt.err (!%p484_p9)
}
 0x1ee   :  { %332 = dma.vmem_to_hbm [thread:$0]  %s327_s24, 512, %s626_s5, [#allocation4], %s495_s28, %s495_s28, %s496_s29  }
 0x1ef   :  { %492 = dma.done.wait [#allocation4], 512  }
 0x1f0   :  { %493 = vsyncadd [#allocation4], 4294966784 }
 0x1f1   :  { %336 = vsyncpa [#allocation3], 1 }
 0x1f2   :  { %337 = vsyncpa [#allocation6], 1 }
 0x1f3   :  { %338 = vsyncpa [#allocation4], 1 }

</bundles_post_ra>
